<compile_context>
chip_gen: v6e
topology: v6e:2x2x1
jax: 0.10.0
libtpu: 0.0.40
codegen_flags: <defaults>
</compile_context>

<pallas_src>
import jax
import jax.numpy as jnp
from jax import lax
from jax.experimental import pallas as pl
from jax.experimental.pallas import tpu as pltpu


def _make_kernel(precision):
    def kernel(x_ref, r_ref, o_ref):
        # (tm, K) input rows @ (K, N) 0/1 replication matrix -> (tm, N) rows.
        # bf16 path: native single-pass MXU matmul (exact: products are 0 or x).
        # f32/f16 path: HIGHEST keeps the multipass decomposition bit-exact.
        y = jnp.dot(x_ref[...], r_ref[...],
                    precision=precision,
                    preferred_element_type=jnp.float32)
        o_ref[...] = y.astype(o_ref.dtype)
    return kernel


def _pick_row_fold(total_rows, w, max_k):
    """Largest hb dividing total_rows with hb*w <= max_k.

    Folding hb image rows per kernel row makes the input block hb*w lanes
    wide (lane-dense for hb*w -> 128) while capping the matmul contraction
    dim so the op stays HBM-bound, not MXU-bound, on all generations.
    """
    best = 1
    hb = 1
    while hb <= total_rows and hb * w <= max_k:
        if total_rows % hb == 0:
            best = hb
        hb += 1
    return best


def _replication_matrix(hb, w, stride, dtype):
    """0/1 matrix R: (folded_rows @ R) == nearest-neighbor upsample."""
    rw = (jnp.arange(w)[:, None]
          == (jnp.arange(w * stride)[None, :] // stride)).astype(dtype)
    rh = (jnp.arange(hb)[:, None]
          == (jnp.arange(hb * stride)[None, :] // stride)).astype(dtype)
    # R[hi*W + wi, (hi*s + kh)*(W*s) + wo] = (wo//s == wi)
    return jnp.kron(rh, rw)                       # (hb*W, s^2*hb*W)


def upsample(x, stride=2):
    assert x.ndim == 4, "expected NCHW input"
    b, c, h, w = x.shape
    s = int(stride)
    if s == 1:
        return x
    if not jnp.issubdtype(x.dtype, jnp.floating):
        # Implicit float round-trip is only exact for small ints; reject.
        raise NotImplementedError("upsample kernel supports float dtypes only")

    fast = x.dtype == jnp.bfloat16                # native single-pass MXU path
    r_dtype = jnp.bfloat16 if fast else jnp.float32
    precision = None if fast else lax.Precision.HIGHEST
    # Cap contraction: keeps MXU work under the HBM roofline even on v5e's
    # weakest (multipass f32) MXU; bf16 single-pass tolerates K=128 everywhere.
    max_k = 128 if fast else 64

    total_rows = b * c * h                        # every image row of every plane
    hb = _pick_row_fold(total_rows, w, max_k)
    m = total_rows // hb                          # kernel rows
    k = hb * w                                    # contraction dim (lanes of input block)
    n = k * s * s                                 # output row width (lane dim)

    esize = x.dtype.itemsize
    r_esize = jnp.dtype(r_dtype).itemsize
    r_bytes = k * n * r_esize
    if r_bytes > 6 * 1024 * 1024:
        # TODO(synk): for very wide images (W beyond ~600 f32) chunk the width
        # into 128-lane pieces with a per-chunk replication matrix instead of
        # falling back to plain XLA broadcast.
        return jnp.reshape(
            jnp.broadcast_to(x[:, :, :, None, :, None], (b, c, h, s, w, s)),
            (b, c, h * s, w * s))

    x2 = x.reshape(m, k)                          # free view (row-major contiguous)
    r = _replication_matrix(hb, w, s, r_dtype)    # small constant, VMEM-resident

    # --- block sizing: ~8 MiB output blocks, double-buffered footprint kept
    # under the 32 MiB scoped VMEM limit (safe on v5e/v6e 128 MiB and v7x 64 MiB).
    sub = {4: 8, 2: 16, 1: 32}.get(esize, 8)      # sublane multiple per dtype
    vmem_budget = 30 * 1024 * 1024 - 2 * r_bytes
    out_block_bytes = min(8 * 1024 * 1024,
                          (vmem_budget * s * s) // (2 * (s * s + 1)))
    tm = max(1, out_block_bytes // (n * esize))
    tm = min(tm, m)
    if m >= sub:
        tm = max(sub, (tm // sub) * sub)          # dtype-specific sublane rounding
        # Keep >=4 grid steps when rows permit: >=2 pipelined steps per v7x
        # TensorCore on the sharded "parallel" axis (no-op cost on v5e/v6e).
        steps = min(4, m // sub)
        if steps >= 2:
            tm = min(tm, max(sub, (-(-m // steps) // sub) * sub))
    grid_m = pl.cdiv(m, tm)

    cost = pl.CostEstimate(
        flops=2 * m * k * n,
        transcendentals=0,
        bytes_accessed=m * k * esize + r_bytes + m * n * esize,
    )

    y2 = pl.pallas_call(
        _make_kernel(precision),
        out_shape=jax.ShapeDtypeStruct((m, n), x.dtype),
        grid=(grid_m,),
        in_specs=[
            pl.BlockSpec((tm, k), lambda i: (i, 0)),   # streamed input rows
            pl.BlockSpec((k, n), lambda i: (0, 0)),    # resident replication matrix
        ],
        out_specs=pl.BlockSpec((tm, n), lambda i: (i, 0)),
        compiler_params=pltpu.CompilerParams(
            dimension_semantics=("parallel",),
            vmem_limit_bytes=32 * 1024 * 1024,
        ),
        cost_estimate=cost,
    )(x2, r)

    # Free view back to NCHW: the (M, N) row order is exactly the
    # (B, C, H*s, W*s) row-major order.
    return y2.reshape(b, c, h * s, w * s)


if __name__ == "__main__":
    key = jax.random.PRNGKey(0)

    def ref_upsample(x, s):
        bb, cc, hh, ww = x.shape
        return jnp.reshape(
            jnp.broadcast_to(x[:, :, :, None, :, None], (bb, cc, hh, s, ww, s)),
            (bb, cc, hh * s, ww * s))

    cases = [
        ((2, 4, 16, 16), jnp.float32, 2),    # canonical f32 path (HIGHEST, exact)
        ((2, 4, 16, 16), jnp.bfloat16, 2),   # native bf16 single-pass MXU path
        ((2, 3, 7, 13), jnp.float32, 2),     # odd shapes / ragged last grid block
        ((1, 2, 6, 8), jnp.float32, 3),      # stride 3
    ]
    keys = jax.random.split(key, len(cases))
    for kk, (shape, dtype, s) in zip(keys, cases):
        x = jax.random.normal(kk, shape, dtype=jnp.float32).astype(dtype)
        out = jax.block_until_ready(upsample(x, stride=s))
        ref = ref_upsample(x, s)
        assert out.shape == ref.shape, f"shape mismatch for {shape} s={s}"
        assert out.dtype == x.dtype
        assert jnp.array_equal(out, ref), f"mismatch for {shape} {dtype} s={s}"
    print("KERNEL_OK")
</pallas_src>

<mosaic_0001>
module attributes {stable_mosaic.version = 11 : i64} {
  func.func @kernel(%arg0: i32, %arg1: memref<8x64xf32, #tpu.memory_space<vmem>>, %arg2: memref<64x256xf32, #tpu.memory_space<vmem>>, %arg3: memref<8x256xf32, #tpu.memory_space<vmem>>) attributes {dimension_semantics = [#tpu.dimension_semantics<parallel>], iteration_bounds = array<i64: 4>, scalar_prefetch = 0 : i64, scratch_operands = 0 : i64, tpu.core_type = #tpu.core_type<tc>, window_params = [{transform_indices = @transform_0, window_bounds = array<i64: 8, 64>}, {pipeline_mode = #tpu.pipeline_mode<synchronous>, transform_indices = @transform_1, window_bounds = array<i64: 64, 256>}, {transform_indices = @transform_2, window_bounds = array<i64: 8, 256>}]} {
    %c0 = arith.constant 0 : index
    %c0_0 = arith.constant 0 : index
    %0 = vector.load %arg1[%c0, %c0_0] : memref<8x64xf32, #tpu.memory_space<vmem>>, vector<8x64xf32>
    %c0_1 = arith.constant 0 : index
    %c0_2 = arith.constant 0 : index
    %1 = vector.load %arg2[%c0_1, %c0_2] : memref<64x256xf32, #tpu.memory_space<vmem>>, vector<64x256xf32>
    %cst = arith.constant dense<0.000000e+00> : vector<8x256xf32>
    %2 = tpu.matmul %0, %1, %cst {dimension_numbers = #tpu.dot_dimension_numbers<[1], [0], [0], [1], [0, 0, 1, 1], [], []>, precision = #tpu.contract_precision<fp32>} : vector<8x64xf32>, vector<64x256xf32>, vector<8x256xf32> -> vector<8x256xf32>
    %c0_3 = arith.constant 0 : index
    %c0_4 = arith.constant 0 : index
    %3 = vector.load %arg3[%c0_3, %c0_4] : memref<8x256xf32, #tpu.memory_space<vmem>>, vector<8x256xf32>
    tpu.vector_store %arg3[%c0_3, %c0_4], %2 {strides = array<i32>} : memref<8x256xf32, #tpu.memory_space<vmem>>, vector<8x256xf32>,
    return
  }
  func.func @transform_0(%arg0: i32) -> (i32, i32) {
    %c0_i32 = arith.constant 0 : i32
    %c0_i32_0 = arith.constant 0 : i32
    return %arg0, %c0_i32 : i32, i32
  }
  func.func @transform_1(%arg0: i32) -> (i32, i32) {
    %c0_i32 = arith.constant 0 : i32
    %c0_i32_0 = arith.constant 0 : i32
    %c0_i32_1 = arith.constant 0 : i32
    return %c0_i32, %c0_i32_0 : i32, i32
  }
  func.func @transform_2(%arg0: i32) -> (i32, i32) {
    %c0_i32 = arith.constant 0 : i32
    %c0_i32_0 = arith.constant 0 : i32
    return %arg0, %c0_i32 : i32, i32
  }
}

</mosaic_0001>

<bundles_post_ra>
// kernel: tpu_custom_call.1
= control target key start
LH: loop header
LB: loop body
LE: loop exit
PB: predicated region body
PF: predicated region fallthrough
CT: control target
= control target key end

     0   :  { %7 = vsyncpa [#allocation3], 0  ;;  %s1602_s0 = inlined_call_operand.hbm [shape: f32[32,64], index: 0, kind: input, shape index: {}]   ;;  %s1603_s1 = inlined_call_operand.hbm [shape: f32[64,256], index: 1, kind: input, shape index: {}]   ;;  %s1604_s2 = inlined_call_operand.hbm [shape: f32[32,256], index: 2, kind: output, shape index: {}]  }
   0x1   :  { %9 = vsyncpa [#allocation3 + $0x1], 0 }
   0x2   :  { %10 = vsyncpa [#allocation6], 0 }
   0x3   :  { %11 = vsyncpa [#allocation4], 0 }
   0x4   :  { %13 = vsyncpa [#allocation4 + $0x1], 0  ;;  %s1160_s9 = smov 0   ;;  %s1162_s10 = smov 0  }
   0x5   :  { %s1164_s11 = smov 0   ;;  %s1166_s12 = smov 0  }
   0x6 LB: > { %s1181_s13 = sadd.s32 4294967295, %s1137_s12   ;;  %s939_s14 = sadd.s32 4294967294, %s1137_s12   ;;  %s1137_s12 = sphi %s1166_s12, %s1625_s12   ;;  %s1133_s11 = sphi %s1164_s11, %s1624_s11   ;;  %s1129_s10 = sphi %s1162_s10, %s1623_s10   ;;  %s1125_s9 = sphi %s1160_s9, %s1622_s9  }
   0x7   : > { %p39_p0 = scmp.ne.s32.totalorder %s1129_s10, %s1125_s9  ;;  %p1605_p1 = scmp.eq.s32.totalorder %s1181_s13, 0 }
   0x8   : > { %p90_p3 = scmp.eq.s32.totalorder %s939_s14, 3  ;;  %p940_p5 = scmp.ge.s32.totalorder %s1137_s12, 1 }
   0x9   : > { %p1190_p4 = por %p1605_p1, %p39_p0  ;;  %p97_p7 = scmp.lt.s32.totalorder %s1137_s12, 5 }
   0xa   : > { %p1195_p6 = por %p90_p3, %p39_p0  ;;  %s1139_s18 = smov [#allocation5]  }
   0xb   : > { %s1609_s15 = scalar_select %p1190_p4, 1, 0 }
   0xc   : > { %s1610_s16 = scalar_select %p1195_p6, 1, 0 }
   0xd   : > { %p1200_p8 = pnand %p940_p5, %p97_p7  ;;  %s109_s19 = sshll.u32 %s1139_s18, 4  ;;  %s110_s19 = int_to_ptr.vmem [resolvable:$true] %s109_s19 }
   0xe   : > { %s1213_s21 = sadd.s32 1, %s1137_s12   ;;  %s26_s22 = sadd.s32 1, %s1133_s11 }
   0xf   : > { %s1611_s17 = scalar_select %p1200_p8, 1, 0 }
  0x10   : > { %p963_p9 = pneg %p1200_p8  ;;  %s23_s23 = ssub.s32 %s1137_s12, %s1213_s21 }
  0x11   : > { %s1026_s24 = scalar_lea.vmem %s110_s19, 2048  ;;  %p1034_p3 = scmp.lt.s32.totalorder %s110_s19, %s110_s19 }
  0x12   : > { %p1208_p10 = pnand %p963_p9, %p1605_p1  ;;  %p1027_p12 = scmp.ne.s32.totalorder %s110_s19, %s1026_s24 }
  0x13   : > { %p1035_p5 = scmp.lt.s32.totalorder %s1026_s24, %s1026_s24 }
  0x14   : > { %p1017_p11 = pneg %p1208_p10 }
  0x15   : > { %p1036_p7 = por %p1035_p5, %p1034_p3 }
  0x16   : > { %p1029_p13 = pnand %p1027_p12, %p1017_p11 }
  0x18   : > { %p1030_p0 = pneg %p1029_p13 }
  0x1a   : > { %p1037_p2 = pnand %p1036_p7, %p1030_p0 }
  0x1c   : > { %1040 = shalt.err (!%p1037_p2)
}
  0x1d   : > { %s1140_s25 = smov 256   ;;  %s1141_s26 = smov 16  }
  0x1e   : > { %966 = dma.hbm_to_vmem [thread:$0]  (!%p1208_p10), %s1603_s1, 2048, %s110_s19, [#allocation6], %s1140_s25, %s1140_s25, %s1141_s26  }
  0x1f   : > { %p24_p9 = scmp.eq.s32.totalorder %s23_s23, 0  ;;  %p33_p11 = scmp.ne.s32.totalorder %s1133_s11, %s1129_s10 }
  0x20   : > { %p34_p12 = scmp.eq.s32.totalorder %s1137_s12, 0  ;;  %p976_p2 = scmp.lt.s32.totalorder %s1137_s12, 4 }
  0x21   : > { %s1230_s29 = scalar_select %p24_p9, %s1133_s11, %s26_s22  }
  0x22   : > { %p35_p13 = por %p34_p12, %p33_p11  ;;  %p1613_p0 = scmp.eq.s32.totalorder %s1181_s13, 3 }
  0x23   : > { %s123_s3 = sand.u32 1, %s1133_s11   ;;  %s944_s4 = sshll.u32 %s1137_s12, 7 }
  0x24   : > { %p1234_p3 = por %p1613_p0, %p33_p11  ;;  %s943_s5 = sshll.u32 %s123_s3, 3 }
  0x25   : > { %s1243_s8 = scalar_lea.hbm %s1602_s0, %s944_s4  ;;  %s127_s14 = scalar_lea.vmem [#allocation2], %s943_s5 }
  0x26   : > { %s1614_s30 = scalar_select %p1234_p3, 1, 0 }
  0x27   : > { %s134_s18 = sshll.u32 %s127_s14, 4  ;;  %p1245_p10 = pnand %p976_p2, %p35_p13  ;;  %s135_s18 = int_to_ptr.vmem [resolvable:$true] %s134_s18 }
  0x28   : > { %s124_s20 = scalar_lea.sflag [#allocation3], %s123_s3  ;;  %s1041_s22 = scalar_lea.hbm %s1243_s8, 128 }
  0x29   : > { %p1042_p5 = scmp.ne.s32.totalorder %s1243_s8, %s1041_s22  ;;  %p1043_p7 = pneg %p1245_p10 }
  0x2a   : > { %s1046_s25 = scalar_lea.hbm %s1602_s0, 512  ;;  %p1047_p12 = scmp.lt.s32.totalorder %s1243_s8, %s1602_s0 }
  0x2b   : > { %p1044_p9 = pnand %p1043_p7, %p1042_p5  ;;  %p1048_p2 = scmp.lt.s32.totalorder %s1046_s25, %s1041_s22 }
  0x2d   : > { %p1045_p11 = pneg %p1044_p9  ;;  %p1049_p13 = por %p1048_p2, %p1047_p12 }
  0x2f   : > { %p1050_p0 = pnand %p1049_p13, %p1045_p11 }
  0x31   : > { %1053 = shalt.err (!%p1050_p0)
}
  0x32   : > { %s1054_s28 = scalar_lea.vmem %s135_s18, 128  ;;  %s1142_s3 = smov [#allocation2]  }
  0x33   : > { %p1055_p1 = scmp.ne.s32.totalorder %s135_s18, %s1054_s28  ;;  %s1059_s4 = sshll.u32 %s1142_s3, 4  ;;  %s1060_s4 = int_to_ptr.vmem [resolvable:$false] %s1059_s4 }
  0x34   : > { %s1061_s5 = scalar_lea.vmem %s1060_s4, 256  ;;  %p1062_p5 = scmp.lt.s32.totalorder %s135_s18, %s1060_s4 }
  0x35   : > { %p1057_p6 = pnand %p1055_p1, %p1043_p7  ;;  %p1063_p9 = scmp.lt.s32.totalorder %s1061_s5, %s1054_s28 }
  0x37   : > { %p1058_p3 = pneg %p1057_p6  ;;  %p1064_p4 = por %p1063_p9, %p1062_p5 }
  0x39   : > { %p1065_p8 = pnand %p1064_p4, %p1058_p3 }
  0x3b   : > { %1068 = shalt.err (!%p1065_p8)
}
  0x3c   : > { %970 = dma.hbm_to_vmem [thread:$0]  (!%p1245_p10), %s1243_s8, 128, %s135_s18, %s124_s20  }
  0x3d   : > { %p1616_p11 = scmp.ne.s32.totalorder %s1611_s17, 0 }
  0x3e   : > { %s1266_s6 = sand.u32 (!%p1616_p11), 1, %s1129_s10   ;;  %p1617_p1 = scmp.ne.s32.totalorder (!%p1616_p11), %s1609_s15, 0 }
  0x3f   : > { %143 = sbr.rel (%p1616_p11) target bundleno = 347 (0x15b), region = 28  ;;  %s946_s7 = sshll.u32 (!%p1616_p11), %s1266_s6, 3 }
  0x40   : > { %s146_s14 = scalar_lea.sflag (!%p1616_p11), [#allocation3], %s1266_s6  ;;  %s1270_s22 = scalar_lea.vmem (!%p1616_p11), [#allocation2], %s946_s7 }
  0x44   : > { %1112 = dma.done.wait (%p1617_p1), %s146_s14, 128  }
  0x45   : > { %1114 = vsyncadd (%p1617_p1), %s146_s14, 4294967168  ;;  %p1618_p4 = scmp.eq.s32.totalorder %s1181_s13, 0 }
  0x47   : > { %1116 = dma.done.wait (%p1618_p4), [#allocation6], 2048   ;;  %p1619_p6 = pmov %p1618_p4 }
  0x48   : > { %v1143_v0 = vmov 0.0   ;;  %v190_v1 = vld [vmem:[#allocation5 + $0x78] sm:$0xff]  ;;  %v189_v2 = vld [vmem:[#allocation5 + $0x70] sm:$0xff]  ;;  %v188_v3 = vld [vmem:[#allocation5 + $0x68] sm:$0xff]  ;;  %vm191_vm0 = vcmask 523264   ;;  %s948_s15 = sshll.u32 %s1266_s6, 4 }
  0x49   : > { %1118 = vsyncadd (%p1619_p6), [#allocation6], 4294965248  ;;  %275 = vmatprep.mubr.f32.mxu0 %v1143_v0  ;;  %431 = vmatprep.mubr.f32.mxu1 %v1143_v0  ;;  %v1282_v4 = vand.u32 4294901760, %v190_v1  ;;  %v1284_v5 = vand.u32 4294901760, %v189_v2  ;;  %v1286_v6 = vand.u32 4294901760, %v188_v3  ;;  %v187_v7 = vld [vmem:[#allocation5 + $0x60] sm:$0xff] }
  0x4a   : > { %v186_v8 = vld [vmem:[#allocation5 + $0x58] sm:$0xff]  ;;  %v185_v9 = vld [vmem:[#allocation5 + $0x50] sm:$0xff]  ;;  %v1288_v10 = vand.u32 4294901760, %v187_v7  ;;  %v184_v13 = vld [vmem:[#allocation5 + $0x48] sm:$0xff]  ;;  %s954_s17 = sshll.u32 %s1181_s13, 8  ;;  %s173_s8 = scalar_lea.vmem [#allocation7], %s948_s15 }
  0x4b   : > { %v1290_v11 = vand.u32 4294901760, %v186_v8  ;;  %v1292_v12 = vand.u32 4294901760, %v185_v9  ;;  %v183_v14 = vld [vmem:[#allocation5 + $0x40] sm:$0xff]  ;;  %v182_v15 = vld [vmem:[#allocation5 + $0x38] sm:$0xff]  ;;  %212 = vmatprep.subr.mxu0 %v1282_v4  ;;  %v1295_v16 = vand.u32 4294901760, %v184_v13  ;;  %v1302_v19 = vsub.f32 %v190_v1, %v1282_v4  ;;  %v181_v20 = vld [vmem:[#allocation5 + $0x30] sm:$0xff]  ;;  %s857_s23 = scalar_lea.hbm %s1604_s2, %s954_s17 }
  0x4c   : > { %v1297_v17 = vand.u32 4294901760, %v183_v14  ;;  %v1299_v18 = vand.u32 4294901760, %v182_v15  ;;  %v1304_v21 = vld [vmem:[#allocation5 + $0x28] sm:$0xff]  ;;  %v1306_v22 = vld [vmem:[#allocation5 + $0x20] sm:$0xff]  ;;  %214 = vmatpush1.msra.mxu0 %v1284_v5  ;;  %v1309_v23 = vand.u32 4294901760, %v181_v20  ;;  %v1312_v24 = vsub.f32 %v189_v2, %v1284_v5  ;;  %v1320_v27 = vld [vmem:[#allocation5 + $0x18] sm:$0xff] }
  0x4d   : > { %v1315_v25 = vand.u32 4294901760, %v1304_v21  ;;  %v1318_v26 = vsub.f32 %v188_v3, %v1286_v6  ;;  %v1322_v28 = vld [vmem:[#allocation5 + $0x10] sm:$0xff]  ;;  %v1324_v29 = vld [vmem:[#allocation5 + $0x8] sm:$0xff]  ;;  %216 = vmatprep.subr.mxu0 %v1286_v6  ;;  %v305_v30 = vand.u32 4294901760, %v1302_v19  ;;  %v1329_v31 = vand.u32 4294901760, %v1306_v22  ;;  %v1346_v38 = vld [vmem:[#allocation5] sm:$0xff] }
  0x4e   : > { %v1332_v32 = vsub.f32 %v187_v7, %v1288_v10  ;;  %v1335_v33 = vand.u32 4294901760, %v1320_v27  ;;  %218 = vmatpush1.msra.mxu0 %v1288_v10  ;;  %v311_v34 = vand.u32 4294901760, %v1312_v24  ;;  %v1341_v36 = vsub.f32 %v186_v8, %v1290_v11  ;;  %v174_v51 = vld [vmem:[%s1270_s22] sm:$0xff]  ;;  %s859_s18 = sshll.u32 %s173_s8, 4  ;;  %s845_s24 = scalar_lea.sflag [#allocation4], %s1266_s6  ;;  %s860_s18 = int_to_ptr.vmem [resolvable:$true] %s859_s18 }
  0x4f   : > { %v317_v35 = vand.u32 4294901760, %v1318_v26  ;;  %v1344_v37 = vand.u32 4294901760, %v1322_v28  ;;  %220 = vmatprep.subr.mxu0 %v1290_v11  ;;  %v306_v39 = vsub.f32 %v1302_v19, %v305_v30  ;;  %v1354_v41 = vsub.f32 %v185_v9, %v1292_v12  ;;  %s1069_s25 = scalar_lea.vmem %s860_s18, 256  ;;  %p1620_p3 = scmp.ne.s32.totalorder %s1614_s30, 0 }
  0x50   : > { %v323_v40 = vand.u32 4294901760, %v1332_v32  ;;  %v1357_v42 = vand.u32 4294901760, %v1324_v29  ;;  %222 = vmatpush1.msra.mxu0 %v1292_v12  ;;  %v312_v43 = vsub.f32 %v1312_v24, %v311_v34  ;;  %v329_v45 = vand.u32 4294901760, %v1341_v36  ;;  %p1070_p8 = scmp.ne.s32.totalorder %s860_s18, %s1069_s25  ;;  %s1144_s13 = smov [#allocation7]  }
  0x51   : > { %v318_v44 = vsub.f32 %v1318_v26, %v317_v35  ;;  %v1368_v46 = vsub.f32 %v184_v13, %v1295_v16  ;;  %224 = vmatprep.subr.mxu0 %v1295_v16  ;;  %v307_v47 = vand.u32 4294901760, %v306_v39  ;;  %v335_v49 = vand.u32 4294901760, %v1354_v41  ;;  %s1073_s26 = sshll.u32 %s1144_s13, 4  ;;  %s1074_s26 = int_to_ptr.vmem [resolvable:$false] %s1073_s26 }
  0x52   : > { %v324_v48 = vsub.f32 %v1332_v32, %v323_v40  ;;  %v1376_v50 = vand.u32 4294901760, %v1346_v38  ;;  %226 = vmatpush1.msra.mxu0 %v1297_v17  ;;  %v313_v52 = vand.u32 4294901760, %v312_v43  ;;  %v330_v54 = vsub.f32 %v1341_v36, %v329_v45  ;;  %p1071_p10 = pnand %p1070_p8, %p1620_p3  ;;  %s1075_s27 = scalar_lea.vmem %s1074_s26, 512 }
  0x53   : > { %v319_v53 = vand.u32 4294901760, %v318_v44  ;;  %v341_v55 = vand.u32 4294901760, %v1368_v46  ;;  %228 = vmatprep.subr.mxu0 %v1299_v18  ;;  %308 = vmatprep.subr.mxu1 %v307_v47  ;;  %v336_v57 = vsub.f32 %v1354_v41, %v335_v49  ;;  %v1389_v58 = vsub.f32 %v183_v14, %v1297_v17  ;;  %p1076_p12 = scmp.lt.s32.totalorder %s860_s18, %s1074_s26  ;;  %p1077_p2 = scmp.lt.s32.totalorder %s1075_s27, %s1069_s25 }
  0x54   : > { %v325_v56 = vand.u32 4294901760, %v324_v48  ;;  %v1392_v59 = vsub.f32 %v182_v15, %v1299_v18  ;;  %230 = vmatpush1.msra.mxu0 %v1309_v23  ;;  %314 = vmatpush1.msra.mxu1 %v313_v52  ;;  %v331_v60 = vand.u32 4294901760, %v330_v54  ;;  %v193_v62 = vsel %vm191_vm0, %v174_v51, 0  ;;  %p1072_p7 = pneg %p1071_p10 }
  0x55   : > { %v342_v61 = vsub.f32 %v1368_v46, %v341_v55  ;;  %v1400_v63 = vsub.f32 %v181_v20, %v1309_v23  ;;  %232 = vmatprep.subr.mxu0 %v1315_v25  ;;  %320 = vmatprep.subr.mxu1 %v319_v53  ;;  %v337_v1 = vand.u32 4294901760, %v336_v57  ;;  %v347_v2 = vand.u32 4294901760, %v1389_v58  ;;  %p1078_p13 = por %p1077_p2, %p1076_p12 }
  0x56   : > { %v353_v3 = vand.u32 4294901760, %v1392_v59  ;;  %v1405_v7 = vand.u32 4294901760, %v193_v62  ;;  %234 = vmatpush1.msra.mxu0 %v1329_v31  ;;  %326 = vmatpush1.msra.mxu1 %v325_v56  ;;  %v1411_v13 = vsub.f32 %v1304_v21, %v1315_v25  ;;  %v1415_v14 = vsub.f32 %v1306_v22, %v1329_v31 }
  0x57   : > { %v343_v8 = vand.u32 4294901760, %v342_v61  ;;  %v359_v9 = vand.u32 4294901760, %v1400_v63  ;;  %236 = vmatprep.subr.mxu0 %v1335_v33  ;;  %332 = vmatprep.subr.mxu1 %v331_v60  ;;  %v348_v15 = vsub.f32 %v1389_v58, %v347_v2  ;;  %v1435_v44 = vsub.f32 %v1320_v27, %v1335_v33  ;;  %p1079_p0 = pnand %p1078_p13, %p1072_p7 }
  0x58   : > { %v354_v20 = vsub.f32 %v1392_v59, %v353_v3  ;;  %v1425_v39 = vsub.f32 %v193_v62, %v1405_v7  ;;  %238 = vmatpush1.msra.mxu0 %v1344_v37  ;;  %338 = vmatpush1.msra.mxu1 %v337_v1  ;;  %v365_v22 = vand.u32 4294901760, %v1411_v13  ;;  %v371_v43 = vand.u32 4294901760, %v1415_v14 }
  0x59   : > { %v360_v21 = vsub.f32 %v1400_v63, %v359_v9  ;;  %240 = vmatprep.subr.mxu0 %v1357_v42  ;;  %344 = vmatprep.subr.mxu1 %v343_v8  ;;  %v349_v47 = vand.u32 4294901760, %v348_v15  ;;  %v1441_v52 = vsub.f32 %v1322_v28, %v1344_v37  ;;  %v377_v56 = vand.u32 4294901760, %v1435_v44 }
  0x5a   : > { %v355_v48 = vand.u32 4294901760, %v354_v20  ;;  %v278_v51 = vand.u32 4294901760, %v1425_v39  ;;  %242 = vmatpush1.msra.mxu0 %v1376_v50  ;;  %v366_v54 = vsub.f32 %v1411_v13, %v365_v22  ;;  %v372_v27 = vsub.f32 %v1415_v14, %v371_v43 }
  0x5b   : > { %v361_v53 = vand.u32 4294901760, %v360_v21  ;;  %350 = vmatpush1.msra.mxu1 %v349_v47  ;;  %457 = vmatprep.subr.mxu0 %v1302_v19  ;;  %v383_v57 = vand.u32 4294901760, %v1441_v52  ;;  %v1458_v60 = vsub.f32 %v1324_v29, %v1357_v42  ;;  %v1462_v61 = vsub.f32 %v1346_v38, %v1376_v50 }
  0x5c   : > { %v279_v28 = vsub.f32 %v1425_v39, %v278_v51  ;;  %356 = vmatprep.subr.mxu1 %v355_v48  ;;  %v367_v62 = vand.u32 4294901760, %v366_v54  ;;  %v373_v1 = vand.u32 4294901760, %v372_v27  ;;  %v378_v8 = vsub.f32 %v1435_v44, %v377_v56 }
  0x5d   : > { %362 = vmatpush1.msra.mxu1 %v361_v53  ;;  %v384_v20 = vsub.f32 %v1441_v52, %v383_v57  ;;  %v389_v29 = vand.u32 4294901760, %v1458_v60  ;;  %v395_v21 = vand.u32 4294901760, %v1462_v61 }
  0x5e   : > { %v280_v15 = vand.u32 4294901760, %v279_v28  ;;  %368 = vmatprep.subr.mxu1 %v367_v62  ;;  %v379_v38 = vand.u32 4294901760, %v378_v8 }
  0x5f   : > { %374 = vmatpush1.msra.mxu1 %v373_v1  ;;  %v385_v47 = vand.u32 4294901760, %v384_v20  ;;  %v390_v48 = vsub.f32 %v1458_v60, %v389_v29  ;;  %v396_v53 = vsub.f32 %v1462_v61, %v395_v21 }
  0x60   : > { %281 = vmatmul.mubr.f32.vlgmr.msra.gmra.mxu0 %v280_v15  ;;  %380 = vmatprep.subr.mxu1 %v379_v38 }
  0x61   : > { %460 = vmatpush1.msra.mxu0 %v1312_v24  ;;  %386 = vmatpush1.msra.mxu1 %v385_v47  ;;  %v391_v54 = vand.u32 4294901760, %v390_v48  ;;  %v397_v27 = vand.u32 4294901760, %v396_v53 }
  0x62   : > { %463 = vmatprep.subr.mxu0 %v1318_v26  ;;  %535 = vmatprep.mubr.f32.mxu0 %v1143_v0 }
  0x63   : > { %466 = vmatpush1.msra.mxu0 %v1332_v32  ;;  %392 = vmatprep.subr.mxu1 %v391_v54 }
  0x64   : > { %469 = vmatprep.subr.mxu0 %v1341_v36  ;;  %398 = vmatpush1.msra.mxu1 %v397_v27 }
  0x65   : > { %472 = vmatpush1.msra.mxu0 %v1354_v41  ;;  %433 = vmatmul.mubr.f32.vlgmr.msra.gmra.mxu1 %v1405_v7 }
  0x66   : > { %475 = vmatprep.subr.mxu0 %v1368_v46  ;;  %561 = vmatprep.subr.mxu1 %v1282_v4 }
  0x67   : > { %478 = vmatpush1.msra.mxu0 %v1389_v58  ;;  %563 = vmatpush1.msra.mxu1 %v1284_v5 }
  0x68   : > { %481 = vmatprep.subr.mxu0 %v1392_v59  ;;  %565 = vmatprep.subr.mxu1 %v1286_v6 }
  0x69   : > { %484 = vmatpush1.msra.mxu0 %v1400_v63  ;;  %567 = vmatpush1.msra.mxu1 %v1288_v10 }
  0x6a   : > { %487 = vmatprep.subr.mxu0 %v1411_v13  ;;  %569 = vmatprep.subr.mxu1 %v1290_v11 }
  0x6b   : > { %490 = vmatpush1.msra.mxu0 %v1415_v14  ;;  %571 = vmatpush1.msra.mxu1 %v1292_v12 }
  0x6c   : > { %493 = vmatprep.subr.mxu0 %v1435_v44  ;;  %573 = vmatprep.subr.mxu1 %v1295_v16 }
  0x6d   : > { %496 = vmatpush1.msra.mxu0 %v1441_v52  ;;  %575 = vmatpush1.msra.mxu1 %v1297_v17 }
  0x6e   : > { %499 = vmatprep.subr.mxu0 %v1458_v60  ;;  %577 = vmatprep.subr.mxu1 %v1299_v18 }
  0x6f   : > { %502 = vmatpush1.msra.mxu0 %v1462_v61  ;;  %579 = vmatpush1.msra.mxu1 %v1309_v23 }
  0x70   : > { %538 = vmatmul.mubr.f32.vlgmr.msra.gmra.mxu0 %v1425_v39  ;;  %653 = vmatprep.subr.mxu0 %v305_v30 }
  0x71   : > { %657 = vmatpush1.msra.mxu0 %v311_v34  ;;  %581 = vmatprep.subr.mxu1 %v1315_v25 }
  0x72   : > { %661 = vmatprep.subr.mxu0 %v317_v35  ;;  %583 = vmatpush1.msra.mxu1 %v1329_v31 }
  0x73   : > { %665 = vmatpush1.msra.mxu0 %v323_v40  ;;  %585 = vmatprep.subr.mxu1 %v1335_v33 }
  0x74   : > { %669 = vmatprep.subr.mxu0 %v329_v45  ;;  %587 = vmatpush1.msra.mxu1 %v1344_v37 }
  0x75   : > { %673 = vmatpush1.msra.mxu0 %v335_v49  ;;  %589 = vmatprep.subr.mxu1 %v1357_v42 }
  0x76   : > { %677 = vmatprep.subr.mxu0 %v341_v55  ;;  %591 = vmatpush1.msra.mxu1 %v1376_v50 }
  0x77   : > { %624 = vmatprep.mubr.f32.mxu1 %v1143_v0  ;;  %681 = vmatpush1.msra.mxu0 %v347_v2 }
  0x78   : > { %628 = vmatmul.mubr.f32.vlgmr.msra.gmra.mxu1 %v278_v51  ;;  %685 = vmatprep.subr.mxu0 %v353_v3 }
  0x79   : > { %771 = vmatprep.subr.mxu1 %v1282_v4  ;;  %689 = vmatpush1.msra.mxu0 %v359_v9 }
  0x7a   : > { %773 = vmatpush1.msra.mxu1 %v1284_v5  ;;  %693 = vmatprep.subr.mxu0 %v365_v22 }
  0x7b   : > { %775 = vmatprep.subr.mxu1 %v1286_v6  ;;  %697 = vmatpush1.msra.mxu0 %v371_v43 }
  0x7c   : > { %777 = vmatpush1.msra.mxu1 %v1288_v10  ;;  %701 = vmatprep.subr.mxu0 %v377_v56 }
  0x7d   : > { %779 = vmatprep.subr.mxu1 %v1290_v11  ;;  %705 = vmatpush1.msra.mxu0 %v383_v57 }
  0x7e   : > { %781 = vmatpush1.msra.mxu1 %v1292_v12  ;;  %709 = vmatprep.subr.mxu0 %v389_v29 }
  0x7f   : > { %783 = vmatprep.subr.mxu1 %v1295_v16  ;;  %713 = vmatpush1.msra.mxu0 %v395_v21 }
  0x80   : > { %746 = vmatprep.mubr.f32.mxu0 %v1143_v0  ;;  %785 = vmatpush1.msra.mxu1 %v1297_v17 }
  0x81   : > { %748 = vmatmul.mubr.f32.vlgmr.msra.gmra.mxu0 %v1405_v7  ;;  %787 = vmatprep.subr.mxu1 %v1299_v18 }
  0x82   : > { %834 = vmatprep.mubr.f32.mxu1 %v1143_v0  ;;  %789 = vmatpush1.msra.mxu1 %v1309_v23 }
  0x83   : > { %791 = vmatprep.subr.mxu1 %v1315_v25 }
  0x84   : > { %793 = vmatpush1.msra.mxu1 %v1329_v31 }
  0x85   : > { %795 = vmatprep.subr.mxu1 %v1335_v33 }
  0x86   : > { %797 = vmatpush1.msra.mxu1 %v1344_v37 }
  0x87   : > { %799 = vmatprep.subr.mxu1 %v1357_v42 }
  0x88   : > { %801 = vmatpush1.msra.mxu1 %v1376_v50 }
  0x89   : > { %836 = vmatmul.mubr.f32.vlgmr.msra.gmra.mxu1 %v1405_v7 }
 0x120   : > { %v282_v4 = vpop.f32.mrf.mxu0 }
 0x122   : > { %v284_v5 = vpop.f32.mrf.mxu0 }
 0x125   : > { %v434_v0 = vpop.f32.mrf.mxu1 }
 0x126   : > { %v435_v16 = vadd.f32 %v434_v0, %v282_v4 }
 0x127   : > { %v436_v10 = vpop.f32.mrf.mxu1 }
 0x128   : > { %v437_v18 = vadd.f32 %v436_v10, %v284_v5 }
 0x130   : > { %v539_v6 = vpop.f32.mrf.mxu0 }
 0x131   : > { %v540_v19 = vadd.f32 %v539_v6, %v435_v16 }
 0x132   : > { %v541_v11 = vpop.f32.mrf.mxu0 }
 0x133   : > { %v542_v24 = vadd.f32 %v541_v11, %v437_v18 }
 0x138   : > { %v629_v12 = vpop.f32.mrf.mxu1 }
 0x139   : > { %v630_v25 = vadd.f32 %v629_v12, %v540_v19 }
 0x13a   : > { %v631_v23 = vpop.f32.mrf.mxu1 }
 0x13b   : > { %v632_v30 = vadd.f32 %v631_v23, %v542_v24 }
 0x141   : > { %v749_v17 = vpop.f32.mrf.mxu0 }
 0x142   : > { %v750_v31 = vadd.f32 %v749_v17, %v630_v25 }
 0x143   : > { %v751_v26 = vpop.f32.mrf.mxu0 }
 0x144   : > { %v752_v33 = vadd.f32 %v751_v26, %v632_v30 }
 0x149   : > { %v837_v32 = vpop.f32.mrf.mxu1 }
 0x14a   : > { %v838_v34 = vadd.f32 %v837_v32, %v750_v31 }
 0x14b   : > { %v839_v35 = vpop.f32.mrf.mxu1 }
 0x14c   : > { %842 = vst [vmem:[%s173_s8] sm:$0xff] %v838_v34  ;;  %v840_v36 = vadd.f32 %v839_v35, %v752_v33 }
 0x14e   : > { %843 = vst [vmem:[%s173_s8 + $0x8] sm:$0xff] %v840_v36 }
 0x14f   : > { %1082 = shalt.err (!%p1079_p0)
}
 0x150   : > { %s1083_s28 = scalar_lea.hbm %s857_s23, 256  ;;  %s1087_s5 = scalar_lea.hbm %s1604_s2, 1024 }
 0x151   : > { %p1084_p5 = scmp.ne.s32.totalorder %s857_s23, %s1083_s28  ;;  %p1088_p1 = scmp.lt.s32.totalorder %s857_s23, %s1604_s2 }
 0x152   : > { %p1089_p4 = scmp.lt.s32.totalorder %s1087_s5, %s1083_s28 }
 0x153   : > { %p1085_p9 = pnand %p1084_p5, %p1620_p3 }
 0x154   : > { %p1090_p6 = por %p1089_p4, %p1088_p1 }
 0x155   : > { %p1086_p11 = pneg %p1085_p9 }
 0x157   : > { %p1091_p8 = pnand %p1090_p6, %p1086_p11 }
 0x159   : > { %1094 = shalt.err (!%p1091_p8)
}
 0x15a   : > { %961 = dma.vmem_to_hbm [thread:$0]  (%p1620_p3), %s860_s18, 256, %s857_s23, %s845_s24  }
 0x15b PF: > { %p978_p10 = scmp.ge.s32.totalorder %s1137_s12, 2  ;;  %s871_s14 = sand.u32 1, %s1125_s9  }
 0x15c   : > { %p1621_p7 = scmp.ne.s32.totalorder %s1610_s16, 0  ;;  %s872_s22 = scalar_lea.sflag [#allocation4], %s871_s14 }
 0x15e   : > { %p972_p12 = pnand %p978_p10, %p1621_p7 }
 0x160   : > { %p973_p2 = pneg %p972_p12 }
 0x162   : > { %1120 = dma.done.wait (%p973_p2), %s872_s22, 256  }
 0x163   : > { %1122 = vsyncadd (%p973_p2), %s872_s22, 4294967040  ;;  %p16_p13 = scmp.ge.s32.totalorder %s1213_s21, 6   ;;  %s1622_s9 = smov %s1129_s10 }
 0x164   : > { %s1623_s10 = smov %s1133_s11  ;;  %s1624_s11 = smov %s1230_s29 }
 0x165   : > { %s1625_s12 = smov %s1213_s21  ;;  %18 = sbr.rel (!%p16_p13) target bundleno = 6 (0x6), region = 77 }
 0x16a   :  { %877 = vsyncpa [#allocation3], 1 }
 0x16b   :  { %879 = vsyncpa [#allocation3 + $0x1], 1 }
 0x16c   :  { %880 = vsyncpa [#allocation6], 1 }
 0x16d   :  { %881 = vsyncpa [#allocation4], 1 }
 0x16e   :  { %883 = vsyncpa [#allocation4 + $0x1], 1 }

</bundles_post_ra>
